<compile_context>
chip_gen: v7x
topology: tpu7x:2x2x1
jax: 0.10.0
libtpu: 0.0.40
codegen_flags: <defaults>
</compile_context>

<pallas_src>
import functools

import jax
import jax.numpy as jnp
from jax.experimental import pallas as pl
from jax.experimental.pallas import tpu as pltpu

TEMP = 0.1
EPS = 1e-8

_FEATURES = {"buffered1": True}   # flipped off at runtime if Buffered(1) is rejected


# -----------------------------------------------------------------------------
# Kernel
# -----------------------------------------------------------------------------
def contrastive_loss_kernel(anchor_t_ref,   # (D, TN)      anchor^T row tile (lane-dense rows)
                            pos_t_ref,      # (D, TN)      pos_pair^T row tile
                            neg_ref,        # (NC, TM, D)  negatives, VMEM-resident
                            mask_ref,       # (NC, 1, TM)  precomputed patch-filter mask
                            out_ref,        # (1, TN)      per-row loss, lane-dense f32
                            *, inv_temp, eps, exp_dtype):
    f32 = jnp.float32
    a_t = anchor_t_ref[...]                                           # native dtype (MXU-friendly)

    # pos = sum_d(anchor * pos_pair) / temp  ->  (1, TN) lane-dense, f32 accumulation.
    pos = jnp.sum(a_t * pos_t_ref[...], axis=0, keepdims=True,
                  dtype=f32) * inv_temp                               # (1, TN)

    nc = neg_ref.shape[0]
    tn = out_ref.shape[-1]

    def masked_chunk(neg_blk, mask_blk, prev_max):
        # Logits on the MXU with native-dtype operands and f32 accumulation; 1/temp is
        # folded in post-matmul so bf16 operands are not re-rounded.
        logits = jax.lax.dot_general(
            neg_blk, a_t, (((1,), (0,)), ((), ())),
            preferred_element_type=f32) * inv_temp                    # (TM, TN) f32
        new_max = jnp.maximum(prev_max, jnp.max(logits, axis=0, keepdims=True))
        # exp in exp_dtype (bf16 on v6e/v7x -> ~2x EUP throughput); masked reduction over
        # M as an MXU matmul instead of VPU multiply + XLU sublane reduce.
        e = jnp.exp((logits - new_max).astype(exp_dtype))             # (TM, TN)
        msum = jax.lax.dot_general(
            mask_blk.astype(exp_dtype), e, (((1,), (0,)), ((), ())),
            preferred_element_type=f32)                               # (1, TN) f32
        return new_max, msum

    if nc == 1:
        # Single shot: the true row max (including the positive) is known before the exps.
        row_max, msum = masked_chunk(neg_ref[0], mask_ref[0], pos)
        exp_pos = jnp.exp(pos - row_max)                              # (1, TN) f32
        denom = msum + exp_pos
    else:
        # Online softmax over M chunks: bounds the live (TM, TN) temporaries so the
        # working set stays inside v7x's 64 MiB per-TC VMEM regardless of M.
        def body(c, carry):
            m_run, s_run = carry
            new_max, msum = masked_chunk(neg_ref[c], mask_ref[c], m_run)
            s_run = s_run * jnp.exp(m_run - new_max) + msum
            return new_max, s_run

        m0 = jnp.full((1, tn), -1e30, f32)
        s0 = jnp.zeros((1, tn), f32)
        m_run, s_run = jax.lax.fori_loop(0, nc, body, (m0, s0))
        row_max = jnp.maximum(m_run, pos)
        exp_pos = jnp.exp(pos - row_max)
        denom = s_run * jnp.exp(m_run - row_max) + exp_pos

    # Unmasked, lane-dense store of the per-row loss.
    out_ref[...] = -jnp.log(exp_pos / (denom + eps) + eps)


# -----------------------------------------------------------------------------
# Wrapper
# -----------------------------------------------------------------------------
def _round_up(x, m):
    return ((x + m - 1) // m) * m


def _tpu_generation():
    try:
        kind = jax.devices()[0].device_kind.lower()
    except Exception:
        return None
    if "v7" in kind or "tpu7" in kind:
        return "v7"
    if "v6" in kind:
        return "v6"
    if "v5" in kind:
        return "v5"
    return None


# Per-generation sizing (TN, vmem cap, bf16 exps, M-chunk threshold).
_GEN_CFG = {
    "v5": dict(tn=256, vmem=96 * 2**20, fast_exp=False, m_thresh=2048),  # 128 MiB VMEM, no bf16 EUP
    "v6": dict(tn=256, vmem=96 * 2**20, fast_exp=True,  m_thresh=2048),  # 128 MiB VMEM, bf16 EUP
    "v7": dict(tn=256, vmem=48 * 2**20, fast_exp=True,  m_thresh=1024),  # 64 MiB per TC
}
_DEFAULT_CFG = dict(tn=128, vmem=None, fast_exp=False, m_thresh=2048)


def _pick_m_chunk(M, m_thresh):
    if M <= m_thresh:
        return M
    for c in (2048, 1024, 512, 256, 128):
        if c <= m_thresh and M % c == 0:
            return c
    # TODO(synk): pad M (with a validity bias folded into the chunk max) when a huge M has
    # no 128-multiple divisor; the single-shot fallback is correct but VMEM-hungry.
    return M


def _resident_spec(block_shape, single_buffer):
    """Grid-invariant operand: VMEM-resident; single-buffered when supported."""
    index_map = lambda i: (0,) * len(block_shape)
    if single_buffer:
        try:
            return pl.BlockSpec(block_shape, index_map, pipeline_mode=pl.Buffered(1))
        except TypeError:   # jax build without per-BlockSpec pipeline_mode
            pass
    return pl.BlockSpec(block_shape, index_map)


def contrastive_loss(anchor, pos_pair, neg_pair, FC, FC_all, *,
                     temp=TEMP, eps=EPS, tn=None, fast_exp=None, m_chunk=None):
    """JAX/Pallas equivalent of ContrastiveLoss.forward. Returns (N,) f32 loss."""
    anchor = jnp.asarray(anchor)
    pos_pair = jnp.asarray(pos_pair)
    neg_pair = jnp.asarray(neg_pair)

    N, D = anchor.shape
    M, D2 = neg_pair.shape
    assert D2 == D and pos_pair.shape == (N, D)

    cfg = _GEN_CFG.get(_tpu_generation(), _DEFAULT_CFG)
    if tn is None:
        tn = cfg["tn"]
    tn = max(128, min(int(tn), _round_up(N, 128)))        # multiple of 128, no oversized pad
    if fast_exp is None:
        fast_exp = cfg["fast_exp"]
    exp_dtype = jnp.bfloat16 if fast_exp else jnp.float32

    grid_n = pl.cdiv(N, tn)
    n_pad = grid_n * tn

    # Lane-dense presentation: rows (N) go on the 128-wide lane axis.
    anchor_t = jnp.swapaxes(anchor, 0, 1)                 # (D, N)
    pos_t = jnp.swapaxes(pos_pair, 0, 1)                  # (D, N)
    if n_pad != N:
        pad = ((0, 0), (0, n_pad - N))
        anchor_t = jnp.pad(anchor_t, pad)
        pos_t = jnp.pad(pos_t, pad)

    # FC[0] >= 0 branch resolved here; ship the final mask lane-dense in the exp dtype.
    fc_all_row = jnp.asarray(FC_all, jnp.float32).reshape(1, M)
    fc0 = jnp.asarray(FC, jnp.float32).reshape(-1)[0]
    mask = jnp.where(fc0 >= 0, fc_all_row < 0.0, fc_all_row >= 0.0).astype(exp_dtype)

    # M-chunking for the in-kernel online-softmax loop.
    if m_chunk is None:
        m_chunk = _pick_m_chunk(M, cfg["m_thresh"])
    m_chunk = int(m_chunk)
    if M % m_chunk != 0:
        m_chunk = M
    nc = M // m_chunk
    neg_c = neg_pair.reshape(nc, m_chunk, D)
    mask_c = mask.reshape(nc, 1, m_chunk)

    itemsize = jnp.dtype(anchor.dtype).itemsize
    flops = 2 * n_pad * M * D + 2 * n_pad * M + 2 * n_pad * D + 6 * n_pad * M
    transcendentals = n_pad * (M + 3)
    bytes_accessed = ((2 * n_pad * D + M * D) * itemsize
                      + M * jnp.dtype(exp_dtype).itemsize + n_pad * 4)

    cp_kwargs = dict(dimension_semantics=("parallel",))   # shard row tiles across TCs (v7x)
    if cfg["vmem"] is not None:
        cp_kwargs["vmem_limit_bytes"] = int(cfg["vmem"])

    kernel = functools.partial(contrastive_loss_kernel,
                               inv_temp=float(1.0 / temp), eps=float(eps),
                               exp_dtype=exp_dtype)

    def _run(single_buffer):
        return pl.pallas_call(
            kernel,
            out_shape=jax.ShapeDtypeStruct((1, n_pad), jnp.float32),
            grid=(grid_n,),
            in_specs=[
                pl.BlockSpec((D, tn), lambda i: (0, i)),          # anchor^T tile (pipelined)
                pl.BlockSpec((D, tn), lambda i: (0, i)),          # pos_pair^T tile (pipelined)
                _resident_spec((nc, m_chunk, D), single_buffer),  # negatives, resident
                _resident_spec((nc, 1, m_chunk), single_buffer),  # mask row, resident
            ],
            out_specs=pl.BlockSpec((1, tn), lambda i: (0, i)),    # lane-dense loss row
            compiler_params=pltpu.CompilerParams(**cp_kwargs),
            cost_estimate=pl.CostEstimate(
                flops=int(flops),
                transcendentals=int(transcendentals),
                bytes_accessed=int(bytes_accessed),
            ),
        )(anchor_t, pos_t, neg_c, mask_c)

    if _FEATURES["buffered1"]:
        try:
            out = _run(True)
        except Exception:
            _FEATURES["buffered1"] = False   # this jax build rejects Buffered(1); degrade
            out = _run(False)
    else:
        out = _run(False)

    return out[0, :N]


# -----------------------------------------------------------------------------
# Pure-JAX reference (mirrors the PyTorch module)
# -----------------------------------------------------------------------------
def contrastive_loss_ref(anchor, pos_pair, neg_pair, FC, FC_all, temp=TEMP, eps=EPS):
    pos = jnp.sum(anchor * pos_pair / temp, axis=-1, keepdims=True)
    fc0 = jnp.asarray(FC).reshape(-1)[0]
    mask_neg = jnp.where(fc0 >= 0, FC_all[None, :] < 0, FC_all[None, :] >= 0).astype(jnp.float32)
    mask = jnp.concatenate([jnp.ones((1, 1), jnp.float32), mask_neg], axis=1)
    cat = jnp.concatenate([pos, anchor @ neg_pair.T / temp], axis=1)
    m = jnp.max(cat, axis=1, keepdims=True)
    exp_sum = jnp.sum(jnp.exp(cat - m) * mask, axis=-1)
    loss = jnp.exp(pos - m)[:, 0] / (exp_sum + eps)
    return -jnp.log(loss + eps)


if __name__ == "__main__":
    key = jax.random.PRNGKey(0)
    k1, k2, k3, k4, k5 = jax.random.split(key, 5)

    N, M, D = 16, 32, 64
    anchor = jax.random.normal(k1, (N, D), jnp.float32)
    pos_pair = jax.random.normal(k2, (N, D), jnp.float32)
    neg_pair = jax.random.normal(k3, (M, D), jnp.float32)
    FC = jax.random.normal(k4, (4,), jnp.float32)          # only FC[0] drives the branch
    FC_all = jax.random.normal(k5, (M,), jnp.float32)

    for fc_test in (FC, -FC):                              # both sides of the FC[0] >= 0 branch
        ref = contrastive_loss_ref(anchor, pos_pair, neg_pair, fc_test, FC_all)

        # Exact (f32-exp) path, single-shot M.
        out = jax.block_until_ready(
            contrastive_loss(anchor, pos_pair, neg_pair, fc_test, FC_all, fast_exp=False))
        assert out.shape == (N,)
        assert jnp.allclose(out, ref, rtol=1e-3, atol=1e-3), (out, ref)

        # Exact path through the in-kernel M-chunked online-softmax loop.
        out_chunk = jax.block_until_ready(
            contrastive_loss(anchor, pos_pair, neg_pair, fc_test, FC_all,
                             fast_exp=False, m_chunk=16))
        assert jnp.allclose(out_chunk, ref, rtol=1e-3, atol=1e-3), (out_chunk, ref)

        # Generation-default path (bf16 exps on v6e/v7x): softmax-denominator tolerance.
        out_fast = jax.block_until_ready(
            contrastive_loss(anchor, pos_pair, neg_pair, fc_test, FC_all))
        assert jnp.allclose(out_fast, ref, rtol=5e-2, atol=5e-2), (out_fast, ref)

    print("KERNEL_OK")
</pallas_src>

<mosaic_0001>
module attributes {stable_mosaic.version = 11 : i64} {
  func.func @contrastive_loss_kernel(%arg0: i32, %arg1: memref<64x128xf32, #tpu.memory_space<vmem>>, %arg2: memref<64x128xf32, #tpu.memory_space<vmem>>, %arg3: memref<1x32x64xf32, #tpu.memory_space<vmem>>, %arg4: memref<1x1x32xf32, #tpu.memory_space<vmem>>, %arg5: memref<1x128xf32, #tpu.memory_space<vmem>>) attributes {dimension_semantics = [#tpu.dimension_semantics<parallel>], iteration_bounds = array<i64: 1>, scalar_prefetch = 0 : i64, scratch_operands = 0 : i64, tpu.core_type = #tpu.core_type<tc>, window_params = [{transform_indices = @transform_0, window_bounds = array<i64: 64, 128>}, {transform_indices = @transform_1, window_bounds = array<i64: 64, 128>}, {pipeline_mode = #tpu.pipeline_mode<synchronous>, transform_indices = @transform_2, window_bounds = array<i64: 1, 32, 64>}, {pipeline_mode = #tpu.pipeline_mode<synchronous>, transform_indices = @transform_3, window_bounds = array<i64: 1, 1, 32>}, {transform_indices = @transform_4, window_bounds = array<i64: 1, 128>}]} {
    %c0 = arith.constant 0 : index
    %c0_0 = arith.constant 0 : index
    %0 = vector.load %arg1[%c0, %c0_0] : memref<64x128xf32, #tpu.memory_space<vmem>>, vector<64x128xf32>
    %c0_1 = arith.constant 0 : index
    %c0_2 = arith.constant 0 : index
    %1 = vector.load %arg2[%c0_1, %c0_2] : memref<64x128xf32, #tpu.memory_space<vmem>>, vector<64x128xf32>
    %2 = arith.mulf %0, %1 : vector<64x128xf32>
    %cst = arith.constant dense<0.000000e+00> : vector<128xf32>
    %3 = vector.multi_reduction <add>, %2, %cst [0] : vector<64x128xf32> to vector<128xf32>
    %4 = vector.shape_cast %3 : vector<128xf32> to vector<1x128xf32>
    %cst_3 = arith.constant 1.000000e+01 : f32
    %5 = vector.broadcast %cst_3 : f32 to vector<1x128xf32>
    %6 = arith.mulf %4, %5 : vector<1x128xf32>
    %c0_4 = arith.constant 0 : index
    %c0_5 = arith.constant 0 : index
    %c0_6 = arith.constant 0 : index
    %7 = vector.load %arg3[%c0_4, %c0_5, %c0_6] : memref<1x32x64xf32, #tpu.memory_space<vmem>>, vector<1x32x64xf32>
    %8 = vector.shape_cast %7 : vector<1x32x64xf32> to vector<32x64xf32>
    %c0_7 = arith.constant 0 : index
    %c0_8 = arith.constant 0 : index
    %c0_9 = arith.constant 0 : index
    %9 = vector.load %arg4[%c0_7, %c0_8, %c0_9] : memref<1x1x32xf32, #tpu.memory_space<vmem>>, vector<1x1x32xf32>
    %10 = vector.shape_cast %9 : vector<1x1x32xf32> to vector<1x32xf32>
    %cst_10 = arith.constant dense<0.000000e+00> : vector<32x128xf32>
    %11 = tpu.matmul %8, %0, %cst_10 {dimension_numbers = #tpu.dot_dimension_numbers<[1], [0], [0], [1], [0, 0, 1, 1], [], []>} : vector<32x64xf32>, vector<64x128xf32>, vector<32x128xf32> -> vector<32x128xf32>
    %cst_11 = arith.constant 1.000000e+01 : f32
    %12 = vector.broadcast %cst_11 : f32 to vector<32x128xf32>
    %13 = arith.mulf %11, %12 : vector<32x128xf32>
    %cst_12 = arith.constant dense<0xFF800000> : vector<128xf32>
    %14 = vector.multi_reduction <maximumf>, %13, %cst_12 [0] : vector<32x128xf32> to vector<128xf32>
    %15 = vector.shape_cast %14 : vector<128xf32> to vector<1x128xf32>
    %16 = arith.maximumf %6, %15 : vector<1x128xf32>
    %17 = vector.broadcast %16 : vector<1x128xf32> to vector<32x128xf32>
    %18 = arith.subf %13, %17 : vector<32x128xf32>
    %19 = math.exp %18 : vector<32x128xf32>
    %cst_13 = arith.constant dense<0.000000e+00> : vector<1x128xf32>
    %20 = tpu.matmul %10, %19, %cst_13 {dimension_numbers = #tpu.dot_dimension_numbers<[1], [0], [0], [1], [0, 0, 1, 1], [], []>} : vector<1x32xf32>, vector<32x128xf32>, vector<1x128xf32> -> vector<1x128xf32>
    %21 = arith.subf %6, %16 : vector<1x128xf32>
    %22 = math.exp %21 : vector<1x128xf32>
    %23 = arith.addf %20, %22 : vector<1x128xf32>
    %cst_14 = arith.constant 9.99999993E-9 : f32
    %24 = vector.broadcast %cst_14 : f32 to vector<1x128xf32>
    %25 = arith.addf %23, %24 : vector<1x128xf32>
    %26 = arith.divf %22, %25 : vector<1x128xf32>
    %cst_15 = arith.constant 9.99999993E-9 : f32
    %27 = vector.broadcast %cst_15 : f32 to vector<1x128xf32>
    %28 = arith.addf %26, %27 : vector<1x128xf32>
    %29 = math.log %28 : vector<1x128xf32>
    %cst_16 = arith.constant 0.000000e+00 : f32
    %30 = vector.broadcast %cst_16 : f32 to vector<1x128xf32>
    %31 = arith.subf %30, %29 : vector<1x128xf32>
    %c0_17 = arith.constant 0 : index
    %c0_18 = arith.constant 0 : index
    %32 = vector.load %arg5[%c0_17, %c0_18] : memref<1x128xf32, #tpu.memory_space<vmem>>, vector<1x128xf32>
    tpu.vector_store %arg5[%c0_17, %c0_18], %31 {strides = array<i32>} : memref<1x128xf32, #tpu.memory_space<vmem>>, vector<1x128xf32>,
    return
  }
  func.func @transform_0(%arg0: i32) -> (i32, i32) {
    %c0_i32 = arith.constant 0 : i32
    %c0_i32_0 = arith.constant 0 : i32
    return %c0_i32, %arg0 : i32, i32
  }
  func.func @transform_1(%arg0: i32) -> (i32, i32) {
    %c0_i32 = arith.constant 0 : i32
    %c0_i32_0 = arith.constant 0 : i32
    return %c0_i32, %arg0 : i32, i32
  }
  func.func @transform_2(%arg0: i32) -> (i32, i32, i32) {
    %c0_i32 = arith.constant 0 : i32
    %c0_i32_0 = arith.constant 0 : i32
    %c0_i32_1 = arith.constant 0 : i32
    %c0_i32_2 = arith.constant 0 : i32
    return %c0_i32, %c0_i32_0, %c0_i32_1 : i32, i32, i32
  }
  func.func @transform_3(%arg0: i32) -> (i32, i32, i32) {
    %c0_i32 = arith.constant 0 : i32
    %c0_i32_0 = arith.constant 0 : i32
    %c0_i32_1 = arith.constant 0 : i32
    %c0_i32_2 = arith.constant 0 : i32
    return %c0_i32, %c0_i32_0, %c0_i32_1 : i32, i32, i32
  }
  func.func @transform_4(%arg0: i32) -> (i32, i32) {
    %c0_i32 = arith.constant 0 : i32
    %c0_i32_0 = arith.constant 0 : i32
    return %c0_i32, %arg0 : i32, i32
  }
}

module attributes {stable_mosaic.version = 11 : i64} {
  func.func @contrastive_loss_kernel(%arg0: i32, %arg1: memref<64x128xf32, #tpu.memory_space<vmem>>, %arg2: memref<64x128xf32, #tpu.memory_space<vmem>>, %arg3: memref<1x32x64xf32, #tpu.memory_space<vmem>>, %arg4: memref<1x1x32xf32, #tpu.memory_space<vmem>>, %arg5: memref<1x128xf32, #tpu.memory_space<vmem>>) attributes {dimension_semantics = [#tpu.dimension_semantics<parallel>], iteration_bounds = array<i64: 1>, scalar_prefetch = 0 : i64, scratch_operands = 0 : i64, tpu.core_type = #tpu.core_type<tc>, window_params = [{transform_indices = @transform_0, window_bounds = array<i64: 64, 128>}, {transform_indices = @transform_1, window_bounds = array<i64: 64, 128>}, {pipeline_mode = #tpu.pipeline_mode<synchronous>, transform_indices = @transform_2, window_bounds = array<i64: 1, 32, 64>}, {pipeline_mode = #tpu.pipeline_mode<synchronous>, transform_indices = @transform_3, window_bounds = array<i64: 1, 1, 32>}, {transform_indices = @transform_4, window_bounds = array<i64: 1, 128>}]} {
    %c0 = arith.constant 0 : index
    %c0_0 = arith.constant 0 : index
    %0 = vector.load %arg1[%c0, %c0_0] : memref<64x128xf32, #tpu.memory_space<vmem>>, vector<64x128xf32>
    %c0_1 = arith.constant 0 : index
    %c0_2 = arith.constant 0 : index
    %1 = vector.load %arg2[%c0_1, %c0_2] : memref<64x128xf32, #tpu.memory_space<vmem>>, vector<64x128xf32>
    %2 = arith.mulf %0, %1 : vector<64x128xf32>
    %cst = arith.constant dense<0.000000e+00> : vector<128xf32>
    %3 = vector.multi_reduction <add>, %2, %cst [0] : vector<64x128xf32> to vector<128xf32>
    %4 = vector.shape_cast %3 : vector<128xf32> to vector<1x128xf32>
    %cst_3 = arith.constant 1.000000e+01 : f32
    %5 = vector.broadcast %cst_3 : f32 to vector<1x128xf32>
    %6 = arith.mulf %4, %5 : vector<1x128xf32>
    %c0_4 = arith.constant 0 : index
    %c0_5 = arith.constant 0 : index
    %c0_6 = arith.constant 0 : index
    %7 = vector.load %arg3[%c0_4, %c0_5, %c0_6] : memref<1x32x64xf32, #tpu.memory_space<vmem>>, vector<1x32x64xf32>
    %8 = vector.shape_cast %7 : vector<1x32x64xf32> to vector<32x64xf32>
    %c0_7 = arith.constant 0 : index
    %c0_8 = arith.constant 0 : index
    %c0_9 = arith.constant 0 : index
    %9 = vector.load %arg4[%c0_7, %c0_8, %c0_9] : memref<1x1x32xf32, #tpu.memory_space<vmem>>, vector<1x1x32xf32>
    %10 = vector.shape_cast %9 : vector<1x1x32xf32> to vector<1x32xf32>
    %cst_10 = arith.constant dense<0.000000e+00> : vector<32x128xf32>
    %11 = tpu.matmul %8, %0, %cst_10 {dimension_numbers = #tpu.dot_dimension_numbers<[1], [0], [0], [1], [0, 0, 1, 1], [], []>} : vector<32x64xf32>, vector<64x128xf32>, vector<32x128xf32> -> vector<32x128xf32>
    %cst_11 = arith.constant 1.000000e+01 : f32
    %12 = vector.broadcast %cst_11 : f32 to vector<32x128xf32>
    %13 = arith.mulf %11, %12 : vector<32x128xf32>
    %cst_12 = arith.constant dense<0xFF800000> : vector<128xf32>
    %14 = vector.multi_reduction <maximumf>, %13, %cst_12 [0] : vector<32x128xf32> to vector<128xf32>
    %15 = vector.shape_cast %14 : vector<128xf32> to vector<1x128xf32>
    %16 = arith.maximumf %6, %15 : vector<1x128xf32>
    %17 = vector.broadcast %16 : vector<1x128xf32> to vector<32x128xf32>
    %18 = arith.subf %13, %17 : vector<32x128xf32>
    %19 = math.exp %18 : vector<32x128xf32>
    %cst_13 = arith.constant dense<0.000000e+00> : vector<1x128xf32>
    %20 = tpu.matmul %10, %19, %cst_13 {dimension_numbers = #tpu.dot_dimension_numbers<[1], [0], [0], [1], [0, 0, 1, 1], [], []>} : vector<1x32xf32>, vector<32x128xf32>, vector<1x128xf32> -> vector<1x128xf32>
    %21 = arith.subf %6, %16 : vector<1x128xf32>
    %22 = math.exp %21 : vector<1x128xf32>
    %23 = arith.addf %20, %22 : vector<1x128xf32>
    %cst_14 = arith.constant 9.99999993E-9 : f32
    %24 = vector.broadcast %cst_14 : f32 to vector<1x128xf32>
    %25 = arith.addf %23, %24 : vector<1x128xf32>
    %26 = arith.divf %22, %25 : vector<1x128xf32>
    %cst_15 = arith.constant 9.99999993E-9 : f32
    %27 = vector.broadcast %cst_15 : f32 to vector<1x128xf32>
    %28 = arith.addf %26, %27 : vector<1x128xf32>
    %29 = math.log %28 : vector<1x128xf32>
    %cst_16 = arith.constant 0.000000e+00 : f32
    %30 = vector.broadcast %cst_16 : f32 to vector<1x128xf32>
    %31 = arith.subf %30, %29 : vector<1x128xf32>
    %c0_17 = arith.constant 0 : index
    %c0_18 = arith.constant 0 : index
    %32 = vector.load %arg5[%c0_17, %c0_18] : memref<1x128xf32, #tpu.memory_space<vmem>>, vector<1x128xf32>
    tpu.vector_store %arg5[%c0_17, %c0_18], %31 {strides = array<i32>} : memref<1x128xf32, #tpu.memory_space<vmem>>, vector<1x128xf32>,
    return
  }
  func.func @transform_0(%arg0: i32) -> (i32, i32) {
    %c0_i32 = arith.constant 0 : i32
    %c0_i32_0 = arith.constant 0 : i32
    return %c0_i32, %arg0 : i32, i32
  }
  func.func @transform_1(%arg0: i32) -> (i32, i32) {
    %c0_i32 = arith.constant 0 : i32
    %c0_i32_0 = arith.constant 0 : i32
    return %c0_i32, %arg0 : i32, i32
  }
  func.func @transform_2(%arg0: i32) -> (i32, i32, i32) {
    %c0_i32 = arith.constant 0 : i32
    %c0_i32_0 = arith.constant 0 : i32
    %c0_i32_1 = arith.constant 0 : i32
    %c0_i32_2 = arith.constant 0 : i32
    return %c0_i32, %c0_i32_0, %c0_i32_1 : i32, i32, i32
  }
  func.func @transform_3(%arg0: i32) -> (i32, i32, i32) {
    %c0_i32 = arith.constant 0 : i32
    %c0_i32_0 = arith.constant 0 : i32
    %c0_i32_1 = arith.constant 0 : i32
    %c0_i32_2 = arith.constant 0 : i32
    return %c0_i32, %c0_i32_0, %c0_i32_1 : i32, i32, i32
  }
  func.func @transform_4(%arg0: i32) -> (i32, i32) {
    %c0_i32 = arith.constant 0 : i32
    %c0_i32_0 = arith.constant 0 : i32
    return %c0_i32, %arg0 : i32, i32
  }
}

</mosaic_0001>

<bundles_post_ra>
// kernel: tpu_custom_call.1
= control target key start
LH: loop header
LB: loop body
LE: loop exit
PB: predicated region body
PF: predicated region fallthrough
CT: control target
= control target key end

     0   :  { %9 = vsyncpa [#allocation3], 0  ;;  %s626_s0 = inlined_call_operand.hbm [shape: f32[64,128], index: 0, kind: input, shape index: {}]   ;;  %s627_s1 = inlined_call_operand.hbm [shape: f32[64,128], index: 1, kind: input, shape index: {}]   ;;  %s628_s2 = inlined_call_operand.hbm [shape: f32[1,32,64], index: 2, kind: input, shape index: {}]   ;;  %s629_s3 = inlined_call_operand.vmem [shape: f32[1,1,32], index: 3, kind: input, shape index: {}]   ;;  %s630_s4 = inlined_call_operand.hbm [shape: f32[1,128], index: 4, kind: output, shape index: {}]  }
   0x1   :  { %10 = vsyncpa [#allocation6], 0 }
   0x2   :  { %11 = vsyncpa [#allocation4], 0  ;;  %s521_s15 = smov [#allocation5]   ;;  %s522_s17 = smov [#allocation2]  }
   0x3   :  { %s29_s16 = sshll.u32 %s521_s15, 4  ;;  %s17_s18 = sshll.u32 %s522_s17, 4  ;;  %s30_s16 = int_to_ptr.vmem [resolvable:$true] %s29_s16  ;;  %s555_s18 = int_to_ptr.vmem [resolvable:$true] %s17_s18 }
   0x4   :  { %s427_s21 = scalar_lea.hbm %s627_s1, 1024 }
   0x5   :  { %p428_p0 = scmp.ne.s32.totalorder %s627_s1, %s427_s21  ;;  %p431_p1 = scmp.lt.u32.totalorder %s427_s21, %s627_s1 }
   0x7   :  { %p433_p2 = pnand %p431_p1, %p428_p0 }
   0x9   :  { %436 = shalt.err (!%p433_p2)
}
   0xa   :  { %s437_s26 = scalar_lea.vmem %s30_s16, 1024  ;;  %p442_p4 = scmp.lt.s32.totalorder %s30_s16, %s30_s16 }
   0xb   :  { %p438_p3 = scmp.ne.s32.totalorder %s30_s16, %s437_s26  ;;  %p443_p5 = scmp.lt.s32.totalorder %s437_s26, %s437_s26 }
   0xd   :  { %p444_p6 = por %p443_p5, %p442_p4 }
   0xf   :  { %p445_p7 = pnand %p444_p6, %p438_p3 }
  0x11   :  { %448 = shalt.err (!%p445_p7)
}
  0x12   :  { %s523_s27 = smov 128   ;;  %s524_s28 = smov 8  }
  0x13   :  { %35 = dma.hbm_to_vmem [thread:$0]  %s627_s1, 1024, %s30_s16, [#allocation6], %s523_s27, %s523_s27, %s524_s28  }
  0x14   :  { %s449_s7 = scalar_lea.hbm %s626_s0, 1024 }
  0x15   :  { %p450_p8 = scmp.ne.s32.totalorder %s626_s0, %s449_s7  ;;  %p453_p9 = scmp.lt.u32.totalorder %s449_s7, %s626_s0 }
  0x17   :  { %p455_p10 = pnand %p453_p9, %p450_p8 }
  0x19   :  { %458 = shalt.err (!%p455_p10)
}
  0x1a   :  { %s459_s12 = scalar_lea.vmem %s555_s18, 1024  ;;  %p464_p12 = scmp.lt.s32.totalorder %s555_s18, %s555_s18 }
  0x1b   :  { %p460_p11 = scmp.ne.s32.totalorder %s555_s18, %s459_s12  ;;  %p465_p13 = scmp.lt.s32.totalorder %s459_s12, %s459_s12 }
  0x1d   :  { %p466_p0 = por %p465_p13, %p464_p12 }
  0x1f   :  { %p467_p1 = pnand %p466_p0, %p460_p11 }
  0x21   :  { %470 = shalt.err (!%p467_p1)
}
  0x22   :  { %23 = dma.hbm_to_vmem [thread:$0]  %s626_s0, 1024, %s555_s18, [#allocation3], %s523_s27, %s523_s27, %s524_s28  }
  0x23   :  { %s525_s14 = smov [#allocation7]   ;;  %s471_s19 = scalar_lea.hbm %s628_s2, 512 }
  0x24   :  { %s41_s15 = sshll.u32 %s525_s14, 4  ;;  %p472_p2 = scmp.ne.s32.totalorder %s628_s2, %s471_s19  ;;  %s42_s15 = int_to_ptr.vmem [resolvable:$true] %s41_s15 }
  0x25   :  { %p475_p3 = scmp.lt.u32.totalorder %s471_s19, %s628_s2 }
  0x27   :  { %p477_p4 = pnand %p475_p3, %p472_p2 }
  0x29   :  { %480 = shalt.err (!%p477_p4)
}
  0x2a   :  { %s481_s24 = scalar_lea.vmem %s42_s15, 512  ;;  %p486_p6 = scmp.lt.s32.totalorder %s42_s15, %s42_s15 }
  0x2b   :  { %p482_p5 = scmp.ne.s32.totalorder %s42_s15, %s481_s24  ;;  %p487_p7 = scmp.lt.s32.totalorder %s481_s24, %s481_s24 }
  0x2d   :  { %p488_p8 = por %p487_p7, %p486_p6 }
  0x2f   :  { %p489_p9 = pnand %p488_p8, %p482_p5 }
  0x31   :  { %492 = shalt.err (!%p489_p9)
}
  0x32   :  { %47 = dma.hbm_to_vmem [thread:$0]  %s628_s2, 512, %s42_s15, [#allocation6], %s523_s27, %s523_s27, %s524_s28  }
  0x33   :  { %515 = dma.done.wait [#allocation3], 1024  }
  0x34   :  { %516 = vsyncadd [#allocation3], 4294966272 }
  0x35   :  { %517 = dma.done.wait [#allocation6], 1536  }
  0x36   :  { %518 = vsyncadd [#allocation6], 4294965760  ;;  %v59_v0 = vld [vmem:[#allocation2] sm:$0xff]  ;;  %v60_v1 = vld [vmem:[#allocation2 + $0x8] sm:$0xff]  ;;  %vm102_vm0 = vcmask 523264   ;;  %v526_v39 = vmov 0.0|0.0  }
  0x37   :  { %v67_v2 = vld [vmem:[#allocation5] sm:$0xff]  ;;  %v68_v3 = vld [vmem:[#allocation5 + $0x8] sm:$0xff]  ;;  %v382_v5 = vpack.c.bf16 %v60_v1, %v59_v0  ;;  %v61_v6 = vld [vmem:[#allocation2 + $0x10] sm:$0xff]  ;;  %398 = vmatprep.subr.bf16.mxu1 %v526_v39  ;;  %vm527_vm1 = vmmov 0   ;;  %v528_v40 = vmov 0.0   ;;  %vm229_vm2 = vcmask 261120  }
  0x38   :  { %v75_v4 = vmul.f32 %v67_v2, %v59_v0  ;;  %v62_v7 = vld [vmem:[#allocation2 + $0x18] sm:$0xff]  ;;  %v76_v8 = vmul.f32 %v68_v3, %v60_v1  ;;  %v69_v9 = vld [vmem:[#allocation5 + $0x10] sm:$0xff]  ;;  %v63_v12 = vld [vmem:[#allocation2 + $0x20] sm:$0xff]  ;;  %379 = vmatprep.mubr.msk.f32.mxu1 %vm527_vm1, %v528_v40  ;;  %s529_s26 = smov [#allocation8]  }
  0x39   :  { %v70_v10 = vld [vmem:[#allocation5 + $0x18] sm:$0xff]  ;;  %v386_v11 = vpack.c.bf16 %v62_v7, %v61_v6  ;;  %383 = vmatprep.subr.bf16.mxu0 %v382_v5  ;;  %v77_v13 = vmul.f32 %v69_v9, %v61_v6  ;;  %v64_v14 = vld [vmem:[#allocation2 + $0x28] sm:$0xff]  ;;  %v71_v15 = vld [vmem:[#allocation5 + $0x20] sm:$0xff]  ;;  %s317_s27 = sshll.u32 %s529_s26, 4  ;;  %s318_s27 = int_to_ptr.vmem [resolvable:$true] %s317_s27 }
  0x3a   :  { %v83_v16 = vadd.f32 %v76_v8, %v75_v4  ;;  %385 = vmatpush3.bf16.msra.mxu0 %v382_v5  ;;  %v78_v17 = vmul.f32 %v70_v10, %v62_v7  ;;  %v72_v18 = vld [vmem:[#allocation5 + $0x28] sm:$0xff]  ;;  %v390_v19 = vpack.c.bf16 %v64_v14, %v63_v12  ;;  %v97_v20 = vld [vmem:[#allocation7] sm:$0xff]  ;;  %v79_v22 = vmul.f32 %v71_v15, %v63_v12  ;;  %v65_v23 = vld [vmem:[#allocation2 + $0x30] sm:$0xff]  ;;  %s497_s28 = scalar_lea.vmem %s318_s27, 32  ;;  %p498_p11 = scmp.lt.s32.totalorder %s318_s27, %s318_s27 }
  0x3b   :  { %387 = vmatprep.subr.bf16.mxu0 %v386_v11  ;;  %v66_v24 = vld [vmem:[#allocation2 + $0x38] sm:$0xff]  ;;  %365 = vmatprep.mubr.msk.f32.mxu0 %vm102_vm0, %v97_v20  ;;  %v73_v25 = vld [vmem:[#allocation5 + $0x30] sm:$0xff]  ;;  %v80_v27 = vmul.f32 %v72_v18, %v64_v14  ;;  %v98_v36 = vld [vmem:[#allocation7 + $0x8] sm:$0xff] }
  0x3c   :  { %v84_v21 = vadd.f32 %v83_v16, %v77_v13  ;;  %v74_v28 = vld [vmem:[#allocation5 + $0x38] sm:$0xff]  ;;  %v394_v29 = vpack.c.bf16 %v66_v24, %v65_v23  ;;  %v81_v31 = vmul.f32 %v73_v25, %v65_v23  ;;  %v99_v37 = vld [vmem:[#allocation7 + $0x10] sm:$0xff] }
  0x3d   :  { %v82_v33 = vmul.f32 %v74_v28, %v66_v24  ;;  %v100_v38 = vld [vmem:[#allocation7 + $0x18] sm:$0xff] }
  0x3e   :  { %v85_v26 = vadd.f32 %v84_v21, %v78_v17  ;;  %389 = vmatpush3.bf16.msra.mxu0 %v386_v11  ;;  %v101_v17 = vld [vmem:[%s629_s3] sm:$0x1]  ;;  %s493_s3 = scalar_lea.vmem %s318_s27, 16 }
  0x3f   :  { %391 = vmatprep.subr.bf16.mxu0 %v390_v19  ;;  %p494_p10 = scmp.ne.s32.totalorder %s318_s27, %s493_s3  ;;  %p499_p12 = scmp.lt.s32.totalorder %s497_s28, %s493_s3 }
  0x40   :  { %v86_v30 = vadd.f32 %v85_v26, %v79_v22 }
  0x41   :  { %p500_p13 = por %p499_p12, %p498_p11 }
  0x42   :  { %v87_v32 = vadd.f32 %v86_v30, %v80_v27  ;;  %393 = vmatpush3.bf16.msra.mxu0 %v390_v19 }
  0x43   :  { %395 = vmatprep.subr.bf16.mxu0 %v394_v29  ;;  %p501_p0 = pnand %p500_p13, %p494_p10 }
  0x44   :  { %v88_v34 = vadd.f32 %v87_v32, %v81_v31 }
  0x46   :  { %v89_v35 = vadd.f32 %v88_v34, %v82_v33  ;;  %397 = vmatpush3.bf16.msra.mxu0 %v394_v29 }
  0x48   :  { %v90_v41 = vrot.slane %v89_v35, 4 }
  0x49   :  { %366 = vmatmul.mubr.msk.f32.vlgmr.msra.gmra.mrb[0].mxu0 %vm102_vm0, %v98_v36 }
  0x4a   :  { %368 = vmatprep.mubr.msk.f32.mxu0 %vm102_vm0, %v99_v37  ;;  %v91_v42 = vadd.f32 %v90_v41, %v89_v35 }
  0x4c   :  { %v92_v47 = vrot.slane %v91_v42, 2 }
  0x4d   :  { %369 = vmatmul.mubr.msk.f32.gmra.mrb[2].mxu0 %vm102_vm0, %v100_v38 }
  0x4e   :  { %v93_v53 = vadd.f32 %v92_v47, %v91_v42 }
  0x50   :  { %v94_v56 = vrot.slane %v93_v53, 1 }
  0x52   :  { %v95_v59 = vadd.f32 %v94_v56, %v93_v53 }
  0x54   :  { %v96_v62 = vmul.f32 10.0, %v95_v59 }
 0x11c   :  { %v367_v43 = vpop.f32.mrb[0].mxu0 }
 0x11d   :  { %v201_v44 = vmul.f32 10.0, %v367_v43  ;;  %v181_v45 = vpop.f32.mrb[1].mxu0 }
 0x11e   :  { %v200_v46 = vmul.f32 10.0, %v181_v45 }
 0x120   :  { %v204_v48 = vmax.f32 %v200_v46, %v201_v44  ;;  %v370_v49 = vpop.f32.mrb[2].mxu0 }
 0x121   :  { %v203_v50 = vmul.f32 10.0, %v370_v49  ;;  %v191_v51 = vpop.f32.mrb[3].mxu0 }
 0x122   :  { %v202_v52 = vmul.f32 10.0, %v191_v51 }
 0x124   :  { %v205_v54 = vmax.f32 %v202_v52, %v203_v50 }
 0x126   :  { %v206_v55 = vmax.f32 %v204_v48, %v205_v54 }
 0x128   :  { %v207_v57 = vrot.slane %v206_v55, 4 }
 0x12a   :  { %v208_v58 = vmax.f32 %v206_v55, %v207_v57 }
 0x12c   :  { %v209_v60 = vrot.slane %v208_v58, 2 }
 0x12e   :  { %v210_v61 = vmax.f32 %v208_v58, %v209_v60 }
 0x130   :  { %v211_v63 = vrot.slane %v210_v61, 1 }
 0x132   :  { %v212_v0 = vmax.f32 %v210_v61, %v211_v63 }
 0x134   :  { %v213_v1 = vmax.f32 %v96_v62, %v212_v0 }
 0x136   :  { %v216_v2 = vsub.f32 %v202_v52, %v213_v1  ;;  %v214_v3 = vsub.f32 %v200_v46, %v213_v1  ;;  %v215_v4 = vsub.f32 %v201_v44, %v213_v1  ;;  %v217_v5 = vsub.f32 %v203_v50, %v213_v1 }
 0x137   :  { %v226_v6 = vsub.f32 %v96_v62, %v213_v1 }
 0x138   :  { %v222_v7 = vmul.f32 1.442695, %v216_v2  ;;  %v218_v8 = vmul.f32 1.442695, %v214_v3  ;;  %v220_v9 = vmul.f32 1.442695, %v215_v4 }
 0x139   :  { %v224_v10 = vmul.f32 1.442695, %v217_v5  ;;  %v227_v18 = vmul.f32 1.442695, %v226_v6 }
 0x13a   :  { %413 = vpow2.f32 %v222_v7 }
 0x13b   :  { %415 = vpow2.f32 %v218_v8 }
 0x13c   :  { %417 = vpow2.f32 %v220_v9 }
 0x13d   :  { %419 = vpow2.f32 %v224_v10 }
 0x13e   :  { %421 = vpow2.f32 %v227_v18 }
 0x144   :  { %v414_v11 = vpop.eup %413 }
 0x145   :  { %v416_v12 = vpop.eup %415 }
 0x146   :  { %v418_v13 = vpop.eup %417 }
 0x147   :  { %v420_v14 = vpop.eup %419  ;;  %v399_v15 = vpack.c.bf16 %v418_v13, %v416_v12 }
 0x148   :  { %v402_v16 = vpack.c.bf16 %v420_v14, %v414_v11  ;;  %v422_v19 = vpop.eup %421 }
 0x149   :  { %400 = vmatpush3.bf16.msra.mxu1 %v399_v15 }
 0x14a   :  { %401 = vmatprep.subr.bf16.mxu1 %v526_v39 }
 0x14d   :  { %403 = vmatpush3.bf16.msra.mxu1 %v402_v16 }
 0x150   :  { %380 = vmatmul.mubr.msk.f32.vlgmr.msra.gmra.mrb[0].mxu1 %vm229_vm2, %v101_v17 }
 0x223   :  { %v299_v20 = vpop.f32.mrb[0].mxu1 }
 0x224   :  { %v300_v21 = vadd.f32 %v422_v19, %v299_v20  ;;  %v381_v22 = vpop.f32.mrb[1].mxu1 }
 0x226   :  { %v303_v23 = vadd.f32 1e-08, %v300_v21 }
 0x228   :  { %423 = vrcp.f32 %v303_v23 }
 0x232   :  { %v424_v24 = vpop.eup %423 }
 0x233   :  { %v305_v25 = vmul.f32 %v424_v24, %v422_v19 }
 0x235   :  { %v306_v26 = vadd.f32 1e-08, %v305_v25 }
 0x237   :  { %425 = vlog2.f32 %v306_v26 }
 0x241   :  { %v426_v27 = vpop.eup %425 }
 0x242   :  { %v308_v28 = vmul.f32 0.6931472, %v426_v27 }
 0x244   :  { %v309_v29 = vsub.f32 0.0, %v308_v28 }
 0x246   :  { %310 = vst [vmem:[#allocation8] sm:$0x1] %v309_v29 }
 0x247   :  { %504 = shalt.err (!%p501_p0)
}
 0x248   :  { %s505_s5 = scalar_lea.hbm %s630_s4, 16 }
 0x249   :  { %p506_p1 = scmp.ne.s32.totalorder %s630_s4, %s505_s5  ;;  %p509_p2 = scmp.lt.u32.totalorder %s505_s5, %s630_s4 }
 0x24b   :  { %p511_p3 = pnand %p509_p2, %p506_p1 }
 0x24d   :  { %514 = shalt.err (!%p511_p3)
}
 0x24e   :  { %320 = dma.vmem_to_hbm [thread:$0]  %s318_s27, 16, %s630_s4, [#allocation4]  }
 0x24f   :  { %519 = dma.done.wait [#allocation4], 16  }
 0x250   :  { %520 = vsyncadd [#allocation4], 4294967280 }
 0x251   :  { %324 = vsyncpa [#allocation3], 1 }
 0x252   :  { %325 = vsyncpa [#allocation6], 1 }
 0x253   :  { %326 = vsyncpa [#allocation4], 1 }

// kernel: tpu_custom_call.1
= control target key start
LH: loop header
LB: loop body
LE: loop exit
PB: predicated region body
PF: predicated region fallthrough
CT: control target
= control target key end

     0   :  { %9 = vsyncpa [#allocation3], 0  ;;  %s626_s0 = inlined_call_operand.hbm [shape: f32[64,128], index: 0, kind: input, shape index: {}]   ;;  %s627_s1 = inlined_call_operand.hbm [shape: f32[64,128], index: 1, kind: input, shape index: {}]   ;;  %s628_s2 = inlined_call_operand.hbm [shape: f32[1,32,64], index: 2, kind: input, shape index: {}]   ;;  %s629_s3 = inlined_call_operand.vmem [shape: f32[1,1,32], index: 3, kind: input, shape index: {}]   ;;  %s630_s4 = inlined_call_operand.hbm [shape: f32[1,128], index: 4, kind: output, shape index: {}]  }
   0x1   :  { %10 = vsyncpa [#allocation6], 0 }
   0x2   :  { %11 = vsyncpa [#allocation4], 0  ;;  %s521_s15 = smov [#allocation5]   ;;  %s522_s17 = smov [#allocation2]  }
   0x3   :  { %s29_s16 = sshll.u32 %s521_s15, 4  ;;  %s17_s18 = sshll.u32 %s522_s17, 4  ;;  %s30_s16 = int_to_ptr.vmem [resolvable:$true] %s29_s16  ;;  %s555_s18 = int_to_ptr.vmem [resolvable:$true] %s17_s18 }
   0x4   :  { %s427_s21 = scalar_lea.hbm %s627_s1, 1024 }
   0x5   :  { %p428_p0 = scmp.ne.s32.totalorder %s627_s1, %s427_s21  ;;  %p431_p1 = scmp.lt.u32.totalorder %s427_s21, %s627_s1 }
   0x7   :  { %p433_p2 = pnand %p431_p1, %p428_p0 }
   0x9   :  { %436 = shalt.err (!%p433_p2)
}
   0xa   :  { %s437_s26 = scalar_lea.vmem %s30_s16, 1024  ;;  %p442_p4 = scmp.lt.s32.totalorder %s30_s16, %s30_s16 }
   0xb   :  { %p438_p3 = scmp.ne.s32.totalorder %s30_s16, %s437_s26  ;;  %p443_p5 = scmp.lt.s32.totalorder %s437_s26, %s437_s26 }
   0xd   :  { %p444_p6 = por %p443_p5, %p442_p4 }
   0xf   :  { %p445_p7 = pnand %p444_p6, %p438_p3 }
  0x11   :  { %448 = shalt.err (!%p445_p7)
}
  0x12   :  { %s523_s27 = smov 128   ;;  %s524_s28 = smov 8  }
  0x13   :  { %35 = dma.hbm_to_vmem [thread:$0]  %s627_s1, 1024, %s30_s16, [#allocation6], %s523_s27, %s523_s27, %s524_s28  }
  0x14   :  { %s449_s7 = scalar_lea.hbm %s626_s0, 1024 }
  0x15   :  { %p450_p8 = scmp.ne.s32.totalorder %s626_s0, %s449_s7  ;;  %p453_p9 = scmp.lt.u32.totalorder %s449_s7, %s626_s0 }
  0x17   :  { %p455_p10 = pnand %p453_p9, %p450_p8 }
  0x19   :  { %458 = shalt.err (!%p455_p10)
}
  0x1a   :  { %s459_s12 = scalar_lea.vmem %s555_s18, 1024  ;;  %p464_p12 = scmp.lt.s32.totalorder %s555_s18, %s555_s18 }
  0x1b   :  { %p460_p11 = scmp.ne.s32.totalorder %s555_s18, %s459_s12  ;;  %p465_p13 = scmp.lt.s32.totalorder %s459_s12, %s459_s12 }
  0x1d   :  { %p466_p0 = por %p465_p13, %p464_p12 }
  0x1f   :  { %p467_p1 = pnand %p466_p0, %p460_p11 }
  0x21   :  { %470 = shalt.err (!%p467_p1)
}
  0x22   :  { %23 = dma.hbm_to_vmem [thread:$0]  %s626_s0, 1024, %s555_s18, [#allocation3], %s523_s27, %s523_s27, %s524_s28  }
  0x23   :  { %s525_s14 = smov [#allocation7]   ;;  %s471_s19 = scalar_lea.hbm %s628_s2, 512 }
  0x24   :  { %s41_s15 = sshll.u32 %s525_s14, 4  ;;  %p472_p2 = scmp.ne.s32.totalorder %s628_s2, %s471_s19  ;;  %s42_s15 = int_to_ptr.vmem [resolvable:$true] %s41_s15 }
  0x25   :  { %p475_p3 = scmp.lt.u32.totalorder %s471_s19, %s628_s2 }
  0x27   :  { %p477_p4 = pnand %p475_p3, %p472_p2 }
  0x29   :  { %480 = shalt.err (!%p477_p4)
}
  0x2a   :  { %s481_s24 = scalar_lea.vmem %s42_s15, 512  ;;  %p486_p6 = scmp.lt.s32.totalorder %s42_s15, %s42_s15 }
  0x2b   :  { %p482_p5 = scmp.ne.s32.totalorder %s42_s15, %s481_s24  ;;  %p487_p7 = scmp.lt.s32.totalorder %s481_s24, %s481_s24 }
  0x2d   :  { %p488_p8 = por %p487_p7, %p486_p6 }
  0x2f   :  { %p489_p9 = pnand %p488_p8, %p482_p5 }
  0x31   :  { %492 = shalt.err (!%p489_p9)
}
  0x32   :  { %47 = dma.hbm_to_vmem [thread:$0]  %s628_s2, 512, %s42_s15, [#allocation6], %s523_s27, %s523_s27, %s524_s28  }
  0x33   :  { %515 = dma.done.wait [#allocation3], 1024  }
  0x34   :  { %516 = vsyncadd [#allocation3], 4294966272 }
  0x35   :  { %517 = dma.done.wait [#allocation6], 1536  }
  0x36   :  { %518 = vsyncadd [#allocation6], 4294965760  ;;  %v59_v0 = vld [vmem:[#allocation2] sm:$0xff]  ;;  %v60_v1 = vld [vmem:[#allocation2 + $0x8] sm:$0xff]  ;;  %vm102_vm0 = vcmask 523264   ;;  %v526_v39 = vmov 0.0|0.0  }
  0x37   :  { %v67_v2 = vld [vmem:[#allocation5] sm:$0xff]  ;;  %v68_v3 = vld [vmem:[#allocation5 + $0x8] sm:$0xff]  ;;  %v382_v5 = vpack.c.bf16 %v60_v1, %v59_v0  ;;  %v61_v6 = vld [vmem:[#allocation2 + $0x10] sm:$0xff]  ;;  %398 = vmatprep.subr.bf16.mxu1 %v526_v39  ;;  %vm527_vm1 = vmmov 0   ;;  %v528_v40 = vmov 0.0   ;;  %vm229_vm2 = vcmask 261120  }
  0x38   :  { %v75_v4 = vmul.f32 %v67_v2, %v59_v0  ;;  %v62_v7 = vld [vmem:[#allocation2 + $0x18] sm:$0xff]  ;;  %v76_v8 = vmul.f32 %v68_v3, %v60_v1  ;;  %v69_v9 = vld [vmem:[#allocation5 + $0x10] sm:$0xff]  ;;  %v63_v12 = vld [vmem:[#allocation2 + $0x20] sm:$0xff]  ;;  %379 = vmatprep.mubr.msk.f32.mxu1 %vm527_vm1, %v528_v40  ;;  %s529_s26 = smov [#allocation8]  }
  0x39   :  { %v70_v10 = vld [vmem:[#allocation5 + $0x18] sm:$0xff]  ;;  %v386_v11 = vpack.c.bf16 %v62_v7, %v61_v6  ;;  %383 = vmatprep.subr.bf16.mxu0 %v382_v5  ;;  %v77_v13 = vmul.f32 %v69_v9, %v61_v6  ;;  %v64_v14 = vld [vmem:[#allocation2 + $0x28] sm:$0xff]  ;;  %v71_v15 = vld [vmem:[#allocation5 + $0x20] sm:$0xff]  ;;  %s317_s27 = sshll.u32 %s529_s26, 4  ;;  %s318_s27 = int_to_ptr.vmem [resolvable:$true] %s317_s27 }
  0x3a   :  { %v83_v16 = vadd.f32 %v76_v8, %v75_v4  ;;  %385 = vmatpush3.bf16.msra.mxu0 %v382_v5  ;;  %v78_v17 = vmul.f32 %v70_v10, %v62_v7  ;;  %v72_v18 = vld [vmem:[#allocation5 + $0x28] sm:$0xff]  ;;  %v390_v19 = vpack.c.bf16 %v64_v14, %v63_v12  ;;  %v97_v20 = vld [vmem:[#allocation7] sm:$0xff]  ;;  %v79_v22 = vmul.f32 %v71_v15, %v63_v12  ;;  %v65_v23 = vld [vmem:[#allocation2 + $0x30] sm:$0xff]  ;;  %s497_s28 = scalar_lea.vmem %s318_s27, 32  ;;  %p498_p11 = scmp.lt.s32.totalorder %s318_s27, %s318_s27 }
  0x3b   :  { %387 = vmatprep.subr.bf16.mxu0 %v386_v11  ;;  %v66_v24 = vld [vmem:[#allocation2 + $0x38] sm:$0xff]  ;;  %365 = vmatprep.mubr.msk.f32.mxu0 %vm102_vm0, %v97_v20  ;;  %v73_v25 = vld [vmem:[#allocation5 + $0x30] sm:$0xff]  ;;  %v80_v27 = vmul.f32 %v72_v18, %v64_v14  ;;  %v98_v36 = vld [vmem:[#allocation7 + $0x8] sm:$0xff] }
  0x3c   :  { %v84_v21 = vadd.f32 %v83_v16, %v77_v13  ;;  %v74_v28 = vld [vmem:[#allocation5 + $0x38] sm:$0xff]  ;;  %v394_v29 = vpack.c.bf16 %v66_v24, %v65_v23  ;;  %v81_v31 = vmul.f32 %v73_v25, %v65_v23  ;;  %v99_v37 = vld [vmem:[#allocation7 + $0x10] sm:$0xff] }
  0x3d   :  { %v82_v33 = vmul.f32 %v74_v28, %v66_v24  ;;  %v100_v38 = vld [vmem:[#allocation7 + $0x18] sm:$0xff] }
  0x3e   :  { %v85_v26 = vadd.f32 %v84_v21, %v78_v17  ;;  %389 = vmatpush3.bf16.msra.mxu0 %v386_v11  ;;  %v101_v17 = vld [vmem:[%s629_s3] sm:$0x1]  ;;  %s493_s3 = scalar_lea.vmem %s318_s27, 16 }
  0x3f   :  { %391 = vmatprep.subr.bf16.mxu0 %v390_v19  ;;  %p494_p10 = scmp.ne.s32.totalorder %s318_s27, %s493_s3  ;;  %p499_p12 = scmp.lt.s32.totalorder %s497_s28, %s493_s3 }
  0x40   :  { %v86_v30 = vadd.f32 %v85_v26, %v79_v22 }
  0x41   :  { %p500_p13 = por %p499_p12, %p498_p11 }
  0x42   :  { %v87_v32 = vadd.f32 %v86_v30, %v80_v27  ;;  %393 = vmatpush3.bf16.msra.mxu0 %v390_v19 }
  0x43   :  { %395 = vmatprep.subr.bf16.mxu0 %v394_v29  ;;  %p501_p0 = pnand %p500_p13, %p494_p10 }
  0x44   :  { %v88_v34 = vadd.f32 %v87_v32, %v81_v31 }
  0x46   :  { %v89_v35 = vadd.f32 %v88_v34, %v82_v33  ;;  %397 = vmatpush3.bf16.msra.mxu0 %v394_v29 }
  0x48   :  { %v90_v41 = vrot.slane %v89_v35, 4 }
  0x49   :  { %366 = vmatmul.mubr.msk.f32.vlgmr.msra.gmra.mrb[0].mxu0 %vm102_vm0, %v98_v36 }
  0x4a   :  { %368 = vmatprep.mubr.msk.f32.mxu0 %vm102_vm0, %v99_v37  ;;  %v91_v42 = vadd.f32 %v90_v41, %v89_v35 }
  0x4c   :  { %v92_v47 = vrot.slane %v91_v42, 2 }
  0x4d   :  { %369 = vmatmul.mubr.msk.f32.gmra.mrb[2].mxu0 %vm102_vm0, %v100_v38 }
  0x4e   :  { %v93_v53 = vadd.f32 %v92_v47, %v91_v42 }
  0x50   :  { %v94_v56 = vrot.slane %v93_v53, 1 }
  0x52   :  { %v95_v59 = vadd.f32 %v94_v56, %v93_v53 }
  0x54   :  { %v96_v62 = vmul.f32 10.0, %v95_v59 }
 0x11c   :  { %v367_v43 = vpop.f32.mrb[0].mxu0 }
 0x11d   :  { %v201_v44 = vmul.f32 10.0, %v367_v43  ;;  %v181_v45 = vpop.f32.mrb[1].mxu0 }
 0x11e   :  { %v200_v46 = vmul.f32 10.0, %v181_v45 }
 0x120   :  { %v204_v48 = vmax.f32 %v200_v46, %v201_v44  ;;  %v370_v49 = vpop.f32.mrb[2].mxu0 }
 0x121   :  { %v203_v50 = vmul.f32 10.0, %v370_v49  ;;  %v191_v51 = vpop.f32.mrb[3].mxu0 }
 0x122   :  { %v202_v52 = vmul.f32 10.0, %v191_v51 }
 0x124   :  { %v205_v54 = vmax.f32 %v202_v52, %v203_v50 }
 0x126   :  { %v206_v55 = vmax.f32 %v204_v48, %v205_v54 }
 0x128   :  { %v207_v57 = vrot.slane %v206_v55, 4 }
 0x12a   :  { %v208_v58 = vmax.f32 %v206_v55, %v207_v57 }
 0x12c   :  { %v209_v60 = vrot.slane %v208_v58, 2 }
 0x12e   :  { %v210_v61 = vmax.f32 %v208_v58, %v209_v60 }
 0x130   :  { %v211_v63 = vrot.slane %v210_v61, 1 }
 0x132   :  { %v212_v0 = vmax.f32 %v210_v61, %v211_v63 }
 0x134   :  { %v213_v1 = vmax.f32 %v96_v62, %v212_v0 }
 0x136   :  { %v216_v2 = vsub.f32 %v202_v52, %v213_v1  ;;  %v214_v3 = vsub.f32 %v200_v46, %v213_v1  ;;  %v215_v4 = vsub.f32 %v201_v44, %v213_v1  ;;  %v217_v5 = vsub.f32 %v203_v50, %v213_v1 }
 0x137   :  { %v226_v6 = vsub.f32 %v96_v62, %v213_v1 }
 0x138   :  { %v222_v7 = vmul.f32 1.442695, %v216_v2  ;;  %v218_v8 = vmul.f32 1.442695, %v214_v3  ;;  %v220_v9 = vmul.f32 1.442695, %v215_v4 }
 0x139   :  { %v224_v10 = vmul.f32 1.442695, %v217_v5  ;;  %v227_v18 = vmul.f32 1.442695, %v226_v6 }
 0x13a   :  { %413 = vpow2.f32 %v222_v7 }
 0x13b   :  { %415 = vpow2.f32 %v218_v8 }
 0x13c   :  { %417 = vpow2.f32 %v220_v9 }
 0x13d   :  { %419 = vpow2.f32 %v224_v10 }
 0x13e   :  { %421 = vpow2.f32 %v227_v18 }
 0x144   :  { %v414_v11 = vpop.eup %413 }
 0x145   :  { %v416_v12 = vpop.eup %415 }
 0x146   :  { %v418_v13 = vpop.eup %417 }
 0x147   :  { %v420_v14 = vpop.eup %419  ;;  %v399_v15 = vpack.c.bf16 %v418_v13, %v416_v12 }
 0x148   :  { %v402_v16 = vpack.c.bf16 %v420_v14, %v414_v11  ;;  %v422_v19 = vpop.eup %421 }
 0x149   :  { %400 = vmatpush3.bf16.msra.mxu1 %v399_v15 }
 0x14a   :  { %401 = vmatprep.subr.bf16.mxu1 %v526_v39 }
 0x14d   :  { %403 = vmatpush3.bf16.msra.mxu1 %v402_v16 }
 0x150   :  { %380 = vmatmul.mubr.msk.f32.vlgmr.msra.gmra.mrb[0].mxu1 %vm229_vm2, %v101_v17 }
 0x223   :  { %v299_v20 = vpop.f32.mrb[0].mxu1 }
 0x224   :  { %v300_v21 = vadd.f32 %v422_v19, %v299_v20  ;;  %v381_v22 = vpop.f32.mrb[1].mxu1 }
 0x226   :  { %v303_v23 = vadd.f32 1e-08, %v300_v21 }
 0x228   :  { %423 = vrcp.f32 %v303_v23 }
 0x232   :  { %v424_v24 = vpop.eup %423 }
 0x233   :  { %v305_v25 = vmul.f32 %v424_v24, %v422_v19 }
 0x235   :  { %v306_v26 = vadd.f32 1e-08, %v305_v25 }
 0x237   :  { %425 = vlog2.f32 %v306_v26 }
 0x241   :  { %v426_v27 = vpop.eup %425 }
 0x242   :  { %v308_v28 = vmul.f32 0.6931472, %v426_v27 }
 0x244   :  { %v309_v29 = vsub.f32 0.0, %v308_v28 }
 0x246   :  { %310 = vst [vmem:[#allocation8] sm:$0x1] %v309_v29 }
 0x247   :  { %504 = shalt.err (!%p501_p0)
}
 0x248   :  { %s505_s5 = scalar_lea.hbm %s630_s4, 16 }
 0x249   :  { %p506_p1 = scmp.ne.s32.totalorder %s630_s4, %s505_s5  ;;  %p509_p2 = scmp.lt.u32.totalorder %s505_s5, %s630_s4 }
 0x24b   :  { %p511_p3 = pnand %p509_p2, %p506_p1 }
 0x24d   :  { %514 = shalt.err (!%p511_p3)
}
 0x24e   :  { %320 = dma.vmem_to_hbm [thread:$0]  %s318_s27, 16, %s630_s4, [#allocation4]  }
 0x24f   :  { %519 = dma.done.wait [#allocation4], 16  }
 0x250   :  { %520 = vsyncadd [#allocation4], 4294967280 }
 0x251   :  { %324 = vsyncpa [#allocation3], 1 }
 0x252   :  { %325 = vsyncpa [#allocation6], 1 }
 0x253   :  { %326 = vsyncpa [#allocation4], 1 }

</bundles_post_ra>
